<compile_context>
chip_gen: v5e
topology: v5e:2x2
jax: 0.10.0
libtpu: 0.0.40
codegen_flags: <defaults>
</compile_context>

<pallas_src>
import math

import jax
import jax.numpy as jnp
import numpy as np
from jax.experimental import pallas as pl
from jax.experimental.pallas import tpu as pltpu


def _mhsa_kernel(head_dim):
    scale = 1.0 / math.sqrt(head_dim)
    d = head_dim

    def kernel(x_ref, w_ref, b_ref, mask_ref, out_ref, scores_ref):
        x = x_ref[0]          # (S, H)
        w = w_ref[0]          # (H, 3d)  this head's fused [q|k|v] weight columns
        bias = b_ref[0]       # (1, 3d)

        # Single fused projection matmul for this head's q/k/v.
        qkv = jnp.dot(x, w, preferred_element_type=jnp.float32) + bias   # (S, 3d)
        q = qkv[:, 0:d] * scale      # fold 1/sqrt(d) into q (S*d mults, not S*S)
        k = qkv[:, d:2 * d]
        v = qkv[:, 2 * d:3 * d]

        # q @ k^T without materializing a transpose of k (contract dim 1 of both).
        s = jax.lax.dot_general(
            q, k, dimension_numbers=(((1,), (1,)), ((), ())),
            preferred_element_type=jnp.float32)                          # (S, S)

        # Additive mask penalty: one (1, S) row per grid step, broadcast over rows.
        neg = 10000.0 * (1.0 - mask_ref[0].astype(jnp.float32))          # (1, S)
        s = s - neg

        # Softmax over the key axis; divide -> EUP reciprocal + broadcast multiply.
        m = jnp.max(s, axis=-1, keepdims=True)
        e = jnp.exp(s - m)
        denom = jnp.sum(e, axis=-1, keepdims=True)                       # (S, 1)
        r = pl.reciprocal(denom, approx=True)        # EUP slot (nearly free)
        r = r * (2.0 - denom * r)                    # one Newton step -> f32 exact
        p = e * r

        # TODO(synk): training-mode dropout on attention probs not implemented
        # (nn.Dropout is the identity in eval mode, which is what we match).

        scores_ref[0, 0] = p.astype(scores_ref.dtype)
        out_ref[0, 0] = jnp.dot(
            p, v, preferred_element_type=jnp.float32).astype(out_ref.dtype)

    return kernel


def multi_headed_self_attention(x, mask, wq, wk, wv, bq, bk, bv, n_heads):
    """x: (B, S, H) f32; mask: (B, S) f32 (1 = keep, 0 = masked).

    Weights are (in, out) applied as x @ W + b (== nn.Linear with W transposed).
    Returns (h, scores) with h: (B, S, H), scores: (B, n_heads, S, S).
    """
    B, S, H = x.shape
    assert H % n_heads == 0
    d = H // n_heads

    # Pack per-head fused QKV weights: w_fused[h] = [wq[:, h*d:(h+1)*d] |
    #                                                wk[:, ...] | wv[:, ...]]
    def per_head(w):                                   # (H, H) -> (n_heads, H, d)
        return jnp.transpose(w.reshape(H, n_heads, d), (1, 0, 2))

    w_fused = jnp.concatenate(
        [per_head(wq), per_head(wk), per_head(wv)], axis=-1)       # (nh, H, 3d)
    b_fused = jnp.concatenate(
        [bq.reshape(n_heads, 1, d),
         bk.reshape(n_heads, 1, d),
         bv.reshape(n_heads, 1, d)], axis=-1)                      # (nh, 1, 3d)
    mask3 = mask.reshape(B, 1, S)                                  # (B, 1, S)

    out_shapes = (
        jax.ShapeDtypeStruct((B, n_heads, S, d), x.dtype),   # per-head outputs
        jax.ShapeDtypeStruct((B, n_heads, S, S), x.dtype),   # attention scores
    )

    grid_spec = pltpu.PrefetchScalarGridSpec(
        num_scalar_prefetch=0,
        grid=(B, n_heads),
        in_specs=[
            pl.BlockSpec((1, S, H), lambda b, h: (b, 0, 0)),      # x (re-DMAed only when b changes)
            pl.BlockSpec((1, H, 3 * d), lambda b, h: (h, 0, 0)),  # fused per-head weights
            pl.BlockSpec((1, 1, 3 * d), lambda b, h: (h, 0, 0)),  # fused per-head bias
            pl.BlockSpec((1, 1, S), lambda b, h: (b, 0, 0)),      # mask row
        ],
        out_specs=[
            pl.BlockSpec((1, 1, S, d), lambda b, h: (b, h, 0, 0)),
            pl.BlockSpec((1, 1, S, S), lambda b, h: (b, h, 0, 0)),
        ],
    )

    h_heads, scores = pl.pallas_call(
        _mhsa_kernel(d),
        out_shape=out_shapes,
        grid_spec=grid_spec,
        compiler_params=pltpu.CompilerParams(
            dimension_semantics=("parallel", "parallel")),
    )(x, w_fused, b_fused, mask3)

    # Merge heads: (B, nh, S, d) -> (B, S, H).  Layout plumbing outside the kernel
    # (matches the reference's transpose(1, 2) + merge_last).
    h_out = jnp.transpose(h_heads, (0, 2, 1, 3)).reshape(B, S, H)
    return h_out, scores


def _reference(x, mask, wq, wk, wv, bq, bk, bv, n_heads):
    """Pure-JAX replica of the PyTorch forward (eval mode)."""
    B, S, H = x.shape
    d = H // n_heads
    q = x @ wq + bq
    k = x @ wk + bk
    v = x @ wv + bv

    def split(t):
        return t.reshape(B, S, n_heads, d).transpose(0, 2, 1, 3)  # (B, nh, S, d)

    q, k, v = split(q), split(k), split(v)
    scores = q @ jnp.swapaxes(k, -2, -1) / np.sqrt(d)
    m = mask[:, None, None, :].astype(jnp.float32)
    scores = scores - 10000.0 * (1.0 - m)
    scores = jax.nn.softmax(scores, axis=-1)
    h = scores @ v                                   # (B, nh, S, d)
    h = h.transpose(0, 2, 1, 3).reshape(B, S, H)
    return h, scores


if __name__ == "__main__":
    B, S, H, n_heads = 2, 8, 32, 4

    key = jax.random.PRNGKey(0)
    kx, kq, kk, kv, kbq, kbk, kbv = jax.random.split(key, 7)

    x = jax.random.normal(kx, (B, S, H), dtype=jnp.float32)
    wq = jax.random.normal(kq, (H, H), dtype=jnp.float32) * 0.1
    wk = jax.random.normal(kk, (H, H), dtype=jnp.float32) * 0.1
    wv = jax.random.normal(kv, (H, H), dtype=jnp.float32) * 0.1
    bq = jax.random.normal(kbq, (H,), dtype=jnp.float32) * 0.1
    bk = jax.random.normal(kbk, (H,), dtype=jnp.float32) * 0.1
    bv = jax.random.normal(kbv, (H,), dtype=jnp.float32) * 0.1

    # mask: last 2 key positions of batch 1 are masked out.
    mask = jnp.ones((B, S), dtype=jnp.float32)
    mask = mask.at[1, -2:].set(0.0)

    h_out, scores = multi_headed_self_attention(
        x, mask, wq, wk, wv, bq, bk, bv, n_heads)
    jax.block_until_ready((h_out, scores))

    h_ref, scores_ref = _reference(x, mask, wq, wk, wv, bq, bk, bv, n_heads)
    np.testing.assert_allclose(np.asarray(h_out), np.asarray(h_ref),
                               rtol=1e-5, atol=1e-5)
    np.testing.assert_allclose(np.asarray(scores), np.asarray(scores_ref),
                               rtol=1e-5, atol=1e-5)

    print("KERNEL_OK")
</pallas_src>

<mosaic_0001>
module attributes {stable_mosaic.version = 11 : i64} {
  func.func @kernel(%arg0: i32, %arg1: i32, %arg2: memref<1x8x32xf32, #tpu.memory_space<vmem>>, %arg3: memref<1x32x24xf32, #tpu.memory_space<vmem>>, %arg4: memref<1x1x24xf32, #tpu.memory_space<vmem>>, %arg5: memref<1x1x8xf32, #tpu.memory_space<vmem>>, %arg6: memref<1x1x8x8xf32, #tpu.memory_space<vmem>>, %arg7: memref<1x1x8x8xf32, #tpu.memory_space<vmem>>) attributes {dimension_semantics = [#tpu.dimension_semantics<parallel>, #tpu.dimension_semantics<parallel>], iteration_bounds = array<i64: 2, 4>, scalar_prefetch = 0 : i64, scratch_operands = 0 : i64, tpu.core_type = #tpu.core_type<tc>, window_params = [{transform_indices = @transform_0, window_bounds = array<i64: 1, 8, 32>}, {transform_indices = @transform_1, window_bounds = array<i64: 1, 32, 24>}, {transform_indices = @transform_2, window_bounds = array<i64: 1, 1, 24>}, {transform_indices = @transform_3, window_bounds = array<i64: 1, 1, 8>}, {transform_indices = @transform_4, window_bounds = array<i64: 1, 1, 8, 8>}, {transform_indices = @transform_5, window_bounds = array<i64: 1, 1, 8, 8>}]} {
    %c0 = arith.constant 0 : index
    %c0_0 = arith.constant 0 : index
    %c0_1 = arith.constant 0 : index
    %0 = vector.load %arg2[%c0, %c0_0, %c0_1] : memref<1x8x32xf32, #tpu.memory_space<vmem>>, vector<1x8x32xf32>
    %1 = vector.shape_cast %0 : vector<1x8x32xf32> to vector<8x32xf32>
    %c0_2 = arith.constant 0 : index
    %c0_3 = arith.constant 0 : index
    %c0_4 = arith.constant 0 : index
    %2 = vector.load %arg3[%c0_2, %c0_3, %c0_4] : memref<1x32x24xf32, #tpu.memory_space<vmem>>, vector<1x32x24xf32>
    %3 = vector.shape_cast %2 : vector<1x32x24xf32> to vector<32x24xf32>
    %c0_5 = arith.constant 0 : index
    %c0_6 = arith.constant 0 : index
    %c0_7 = arith.constant 0 : index
    %4 = vector.load %arg4[%c0_5, %c0_6, %c0_7] : memref<1x1x24xf32, #tpu.memory_space<vmem>>, vector<1x1x24xf32>
    %5 = vector.shape_cast %4 : vector<1x1x24xf32> to vector<1x24xf32>
    %cst = arith.constant dense<0.000000e+00> : vector<8x24xf32>
    %6 = tpu.matmul %1, %3, %cst {dimension_numbers = #tpu.dot_dimension_numbers<[1], [0], [0], [1], [0, 0, 1, 1], [], []>} : vector<8x32xf32>, vector<32x24xf32>, vector<8x24xf32> -> vector<8x24xf32>
    %7 = vector.broadcast %5 : vector<1x24xf32> to vector<8x24xf32>
    %8 = arith.addf %6, %7 : vector<8x24xf32>
    %9 = vector.extract_strided_slice %8 {offsets = [0, 0], sizes = [8, 8], strides = [1, 1]} : vector<8x24xf32> to vector<8x8xf32>
    %cst_8 = arith.constant 0.353553385 : f32
    %10 = vector.broadcast %cst_8 : f32 to vector<8x8xf32>
    %11 = arith.mulf %9, %10 : vector<8x8xf32>
    %12 = vector.extract_strided_slice %8 {offsets = [0, 8], sizes = [8, 8], strides = [1, 1]} : vector<8x24xf32> to vector<8x8xf32>
    %13 = vector.extract_strided_slice %8 {offsets = [0, 16], sizes = [8, 8], strides = [1, 1]} : vector<8x24xf32> to vector<8x8xf32>
    %cst_9 = arith.constant dense<0.000000e+00> : vector<8x8xf32>
    %14 = tpu.matmul %11, %12, %cst_9 {dimension_numbers = #tpu.dot_dimension_numbers<[1], [1], [0], [0], [0, 0, 1, 0], [], []>} : vector<8x8xf32>, vector<8x8xf32>, vector<8x8xf32> -> vector<8x8xf32>
    %c0_10 = arith.constant 0 : index
    %c0_11 = arith.constant 0 : index
    %c0_12 = arith.constant 0 : index
    %15 = vector.load %arg5[%c0_10, %c0_11, %c0_12] : memref<1x1x8xf32, #tpu.memory_space<vmem>>, vector<1x1x8xf32>
    %16 = vector.shape_cast %15 : vector<1x1x8xf32> to vector<1x8xf32>
    %cst_13 = arith.constant 1.000000e+00 : f32
    %17 = vector.broadcast %cst_13 : f32 to vector<1x8xf32>
    %18 = arith.subf %17, %16 : vector<1x8xf32>
    %cst_14 = arith.constant 1.000000e+04 : f32
    %19 = vector.broadcast %cst_14 : f32 to vector<1x8xf32>
    %20 = arith.mulf %19, %18 : vector<1x8xf32>
    %21 = vector.broadcast %20 : vector<1x8xf32> to vector<8x8xf32>
    %22 = arith.subf %14, %21 : vector<8x8xf32>
    %cst_15 = arith.constant dense<0xFF800000> : vector<8xf32>
    %23 = vector.multi_reduction <maximumf>, %22, %cst_15 [1] : vector<8x8xf32> to vector<8xf32>
    %24 = vector.shape_cast %23 : vector<8xf32> to vector<8x1xf32>
    %25 = vector.broadcast %24 : vector<8x1xf32> to vector<8x8xf32>
    %26 = arith.subf %22, %25 : vector<8x8xf32>
    %27 = math.exp %26 : vector<8x8xf32>
    %cst_16 = arith.constant dense<0.000000e+00> : vector<8xf32>
    %28 = vector.multi_reduction <add>, %27, %cst_16 [1] : vector<8x8xf32> to vector<8xf32>
    %29 = vector.shape_cast %28 : vector<8xf32> to vector<8x1xf32>
    %30 = tpu.reciprocal %29 {approx = true} : vector<8x1xf32> -> vector<8x1xf32>
    %31 = arith.mulf %29, %30 : vector<8x1xf32>
    %cst_17 = arith.constant 2.000000e+00 : f32
    %32 = vector.broadcast %cst_17 : f32 to vector<8x1xf32>
    %33 = arith.subf %32, %31 : vector<8x1xf32>
    %34 = arith.mulf %30, %33 : vector<8x1xf32>
    %35 = vector.broadcast %34 : vector<8x1xf32> to vector<8x8xf32>
    %36 = arith.mulf %27, %35 : vector<8x8xf32>
    %c0_18 = arith.constant 0 : index
    %c0_19 = arith.constant 0 : index
    %c0_20 = arith.constant 0 : index
    %c0_21 = arith.constant 0 : index
    %37 = vector.load %arg7[%c0_18, %c0_19, %c0_20, %c0_21] : memref<1x1x8x8xf32, #tpu.memory_space<vmem>>, vector<1x1x8x8xf32>
    %38 = vector.shape_cast %37 : vector<1x1x8x8xf32> to vector<8x8xf32>
    %39 = vector.shape_cast %36 : vector<8x8xf32> to vector<1x1x8x8xf32>
    tpu.vector_store %arg7[%c0_18, %c0_19, %c0_20, %c0_21], %39 {strides = array<i32>} : memref<1x1x8x8xf32, #tpu.memory_space<vmem>>, vector<1x1x8x8xf32>,
    %cst_22 = arith.constant dense<0.000000e+00> : vector<8x8xf32>
    %40 = tpu.matmul %36, %13, %cst_22 {dimension_numbers = #tpu.dot_dimension_numbers<[1], [0], [0], [1], [0, 0, 1, 1], [], []>} : vector<8x8xf32>, vector<8x8xf32>, vector<8x8xf32> -> vector<8x8xf32>
    %c0_23 = arith.constant 0 : index
    %c0_24 = arith.constant 0 : index
    %c0_25 = arith.constant 0 : index
    %c0_26 = arith.constant 0 : index
    %41 = vector.load %arg6[%c0_23, %c0_24, %c0_25, %c0_26] : memref<1x1x8x8xf32, #tpu.memory_space<vmem>>, vector<1x1x8x8xf32>
    %42 = vector.shape_cast %41 : vector<1x1x8x8xf32> to vector<8x8xf32>
    %43 = vector.shape_cast %40 : vector<8x8xf32> to vector<1x1x8x8xf32>
    tpu.vector_store %arg6[%c0_23, %c0_24, %c0_25, %c0_26], %43 {strides = array<i32>} : memref<1x1x8x8xf32, #tpu.memory_space<vmem>>, vector<1x1x8x8xf32>,
    return
  }
  func.func @transform_0(%arg0: i32, %arg1: i32) -> (i32, i32, i32) {
    %c0_i32 = arith.constant 0 : i32
    %c0_i32_0 = arith.constant 0 : i32
    %c0_i32_1 = arith.constant 0 : i32
    return %arg0, %c0_i32, %c0_i32_0 : i32, i32, i32
  }
  func.func @transform_1(%arg0: i32, %arg1: i32) -> (i32, i32, i32) {
    %c0_i32 = arith.constant 0 : i32
    %c0_i32_0 = arith.constant 0 : i32
    %c0_i32_1 = arith.constant 0 : i32
    return %arg1, %c0_i32, %c0_i32_0 : i32, i32, i32
  }
  func.func @transform_2(%arg0: i32, %arg1: i32) -> (i32, i32, i32) {
    %c0_i32 = arith.constant 0 : i32
    %c0_i32_0 = arith.constant 0 : i32
    %c0_i32_1 = arith.constant 0 : i32
    return %arg1, %c0_i32, %c0_i32_0 : i32, i32, i32
  }
  func.func @transform_3(%arg0: i32, %arg1: i32) -> (i32, i32, i32) {
    %c0_i32 = arith.constant 0 : i32
    %c0_i32_0 = arith.constant 0 : i32
    %c0_i32_1 = arith.constant 0 : i32
    return %arg0, %c0_i32, %c0_i32_0 : i32, i32, i32
  }
  func.func @transform_4(%arg0: i32, %arg1: i32) -> (i32, i32, i32, i32) {
    %c0_i32 = arith.constant 0 : i32
    %c0_i32_0 = arith.constant 0 : i32
    %c0_i32_1 = arith.constant 0 : i32
    return %arg0, %arg1, %c0_i32, %c0_i32_0 : i32, i32, i32, i32
  }
  func.func @transform_5(%arg0: i32, %arg1: i32) -> (i32, i32, i32, i32) {
    %c0_i32 = arith.constant 0 : i32
    %c0_i32_0 = arith.constant 0 : i32
    %c0_i32_1 = arith.constant 0 : i32
    return %arg0, %arg1, %c0_i32, %c0_i32_0 : i32, i32, i32, i32
  }
}

</mosaic_0001>

<bundles_post_ra>
// kernel: tpu_custom_call.1
= control target key start
LH: loop header
LB: loop body
LE: loop exit
PB: predicated region body
PF: predicated region fallthrough
CT: control target
= control target key end

     0   :  { %s1009_s0 = inlined_call_operand.vmem [shape: f32[2,8,32], index: 0, kind: input, shape index: {}]   ;;  %s1010_s1 = inlined_call_operand.vmem [shape: f32[4,32,24], index: 1, kind: input, shape index: {}]   ;;  %s1011_s2 = inlined_call_operand.vmem [shape: f32[4,1,24], index: 2, kind: input, shape index: {}]   ;;  %s1012_s3 = inlined_call_operand.vmem [shape: f32[2,1,8], index: 3, kind: input, shape index: {}]   ;;  %s1013_s4 = inlined_call_operand.hbm [shape: f32[2,4,8,8], index: 4, kind: output, shape index: {0}]   ;;  %s1014_s5 = inlined_call_operand.hbm [shape: f32[2,4,8,8], index: 5, kind: output, shape index: {1}]  }
   0x1   :  { %1017 = sst [smem:[#allocation9_spill]] %s1009_s0 }
   0x2   :  { %1018 = sst [smem:[#allocation10_spill]] %s1010_s1 }
   0x3   :  { %11 = vsyncpa [#allocation3], 0 }
   0x4   :  { %13 = vsyncpa [#allocation3 + $0x1], 0 }
   0x5   :  { %14 = vsyncpa [#allocation5], 0 }
   0x6   :  { %16 = vsyncpa [#allocation5 + $0x1], 0  ;;  %s849_s18 = smov 0   ;;  %s851_s19 = smov 0  }
   0x7   :  { %s853_s20 = smov 0   ;;  %s855_s21 = smov 0  }
   0x8   :  { %s857_s22 = smov 0   ;;  %s859_s23 = smov 0  }
   0x9   :  { %s861_s24 = smov 0   ;;  %s863_s25 = smov 0  }
   0xa LB: > { %s583_s26 = sadd.s32 4294967295, %s815_s25   ;;  %s584_s27 = sadd.s32 4294967294, %s815_s25   ;;  %s815_s25 = sphi %s863_s25, %s22_s25   ;;  %s811_s24 = sphi %s861_s24, %s1032_s24   ;;  %s807_s23 = sphi %s859_s23, %s1031_s23   ;;  %s803_s22 = sphi %s857_s22, %s1030_s22   ;;  %s799_s21 = sphi %s855_s21, %s1029_s21   ;;  %s795_s20 = sphi %s853_s20, %s1028_s20   ;;  %s791_s19 = sphi %s851_s19, %s1027_s19   ;;  %s787_s18 = sphi %s849_s18, %s1026_s18  }
   0xb   : > { %s31_s28 = sadd.s32 1, %s807_s23  ;;  %s34_s29 = sadd.s32 1, %s811_s24 }
   0xc   : > { %p32_p0 = scmp.ge.s32.totalorder %s31_s28, 4  ;;  %p157_p1 = scmp.ne.s32.totalorder %s795_s20, %s791_s19 }
   0xd   : > { %p158_p2 = scmp.eq.s32.totalorder %s583_s26, 7  ;;  %p163_p5 = scmp.ne.s32.totalorder %s791_s19, %s787_s18 }
   0xe   : > { %s1034_s28 = smov (%p32_p0, %s31_s28), 0  ;;  %s1036_s29 = smov (!%p32_p0, %s34_s29), %s811_s24 }
   0xf   : > { %s143_s30 = ssub.s32 %s807_s23, %s1034_s28  ;;  %p900_p3 = por %p158_p2, %p157_p1 }
  0x10   : > { %p36_p4 = scmp.ge.s32.totalorder %s1036_s29, 2  ;;  %p164_p6 = scmp.eq.s32.totalorder %s584_s27, 7 }
  0x11   : > { %p587_p7 = scmp.ge.s32.totalorder %s815_s25, 1  ;;  %p237_p9 = scmp.lt.s32.totalorder %s815_s25, 9 }
  0x12   : > { %s1038_s29 = smov (%p36_p4, %s1036_s29), 0  ;;  %p909_p8 = por %p164_p6, %p163_p5 }
  0x13   : > { %1020 = sst [smem:[#allocation8_spill]] %s1038_s29  ;;  %s142_s8 = ssub.s32 %s811_s24, %s1038_s29 }
  0x14   : > { %s147_s9 = sadd.s32 1, %s795_s20  ;;  %s144_s10 = sor.u32 %s143_s30, %s142_s8 }
  0x15   : > { %p238_p10 = pnand %p587_p7, %p237_p9  ;;  %p145_p11 = scmp.eq.s32.totalorder %s144_s10, 0 }
  0x16   : > { %p284_p12 = scmp.lt.s32.totalorder (!%p238_p10), %s799_s21, 3  ;;  %p280_p13 = scmp.lt.s32.totalorder (!%p238_p10), %s803_s22, 1 }
  0x17   : > { %s918_s11 = scalar_select %p145_p11, %s795_s20, %s147_s9  }
  0x18   : > { %241 = sbr.rel (%p238_p10) target bundleno = 820 (0x334), region = 36  ;;  %s1022_s1 = sld [smem:[#allocation10_spill]] (!%p238_p10) }
  0x19   : > { %s1023_s0 = sld [smem:[#allocation9_spill]] (!%p238_p10)  ;;  %s599_s27 = sshll.u32 (!%p238_p10), %s803_s22, 2 }
  0x1d   : > { %s285_s12 = scalar_select %p284_p12, %s799_s21, 3  ;;  %vm304_vm0 = vcmask 261120   ;;  %vm332_vm1 = vcmask 64512  }
  0x1e   : > { %s281_s13 = scalar_select %p280_p13, %s803_s22, 1 }
  0x1f   : > { %s605_s14 = sshll.u32 %s285_s12, 5  ;;  %s291_s17 = scalar_lea.vmem %s1011_s2, %s285_s12 }
  0x20   : > { %s288_s30 = scalar_lea.vmem %s1022_s1, %s605_s14  ;;  %s590_s8 = sshll.u32 %s281_s13, 3  ;;  %v684_v5 = vld [vmem:[%s291_s17] ss:$0 sm:$0xff] }
  0x21   : > { %v299_v0 = vld [vmem:[%s288_s30 + $0x18] sm:$0xff]  ;;  %v298_v1 = vld [vmem:[%s288_s30 + $0x10] sm:$0xff]  ;;  %v297_v2 = vld [vmem:[%s288_s30 + $0x8] sm:$0xff]  ;;  %s283_s29 = scalar_lea.vmem %s1023_s0, %s590_s8  ;;  %s817_s12 = smov 120  }
  0x22   : > { %320 = vmatpush.msra.mxu0 %v299_v0  ;;  %v296_v3 = vld [vmem:[%s288_s30] sm:$0xff]  ;;  %s294_s16 = scalar_lea.vmem %s1012_s3, %s281_s13  ;;  %s941_s13 = sand.u32 1, %s791_s19  }
  0x23   : > { %v295_v4 = vld [vmem:[%s283_s29] sm:$0xff]  ;;  %s818_s29 = smov 112   ;;  %s1016_s17 = sshll.u32 %s941_s13, 3 }
  0x24   : > { %321 = vmatpush.msra.mxu0 %v298_v1  ;;  %v358_v10 = vld [vmem:[%s294_s16] sm:$0x1]  ;;  %s279_s26 = scalar_lea.vmem [#allocation4], %s1016_s17  ;;  %s423_s30 = sadd.s32 %s799_s21, %s599_s27 }
  0x25   : > { %v359_v11 = vsub.f32 1.0, %v358_v10  ;;  %s600_s8 = sshll.u32 %s423_s30, 3  ;;  %s443_s14 = sshll.u32 %s279_s26, 4  ;;  %s444_s14 = int_to_ptr.vmem [resolvable:$true] %s443_s14 }
  0x26   : > { %322 = vmatpush.msra.mxu0 %v297_v2  ;;  %s413_s16 = scalar_lea.sflag [#allocation5], %s941_s13  ;;  %s709_s21 = scalar_lea.hbm %s1014_s5, 64 }
  0x27   : > { %v360_v12 = vmul.f32 10000.0, %v359_v11 }
  0x28   : > { %323 = vmatpush.msra.mxu0 %v296_v3 }
  0x29   : > { %593 = vmatmul.msk.f32.vlgmr.msra.gmra.mxu0 %vm304_vm0, %v295_v4  ;;  %v362_v13 = vperm.slane %v360_v12, 0 }
  0xa6   : > { %v325_v6 = vpop.f32.mrf.mxu0 }
  0xa7   : > { %v326_v7 = vadd.f32 %v684_v5, %v325_v6 }
  0xa9   : > { %330 = vrot.lane.b32.xlu0 %v326_v7, %s817_s12  ;;  %v328_v9 = vmul.f32 0.35355338, %v326_v7  ;;  %s441_s12 = scalar_lea.hbm %s1014_s5, %s600_s8 }
  0xaa   : > { %s445_s15 = sshll.u32 %s441_s12, 4  ;;  %s446_s15 = int_to_ptr.hbm [resolvable:$true] %s445_s15 }
 0x11b   : > { %v331_v8 = vpop.permute.xlu0 %330 }
 0x11c   : > { %594 = vmatpush.xpose.msk.msra.mxu1 %vm332_vm1, %v331_v8 }
 0x11f   : > { %595 = vmatmul.msk.f32.vlgmr.msra.gmra.mxu1 %vm332_vm1, %v328_v9 }
 0x19c   : > { %v355_v14 = vpop.f32.mrf.mxu1 }
 0x19d   : > { %v364_v15 = vsub.f32 %v355_v14, %v362_v13 }
 0x19f   : > { %v365_v16 = vsel %vm332_vm1, %v364_v15, -inf }
 0x1a0   : > { %366 = vmax.xlane.f32.xlu0 %v365_v16 }
 0x213   : > { %v367_v17 = vpop.xlane.xlu0 %366 }
 0x214   : > { %v368_v18 = vsub.f32 %v364_v15, %v367_v17 }
 0x216   : > { %v369_v19 = vmul.f32 1.442695, %v368_v18 }
 0x218   : > { %685 = vpow2.f32 %v369_v19 }
 0x21e   : > { %v686_v20 = vpop.eup %685 }
 0x21f   : > { %v371_v21 = vsel %vm332_vm1, %v686_v20, 0.0 }
 0x220   : > { %372 = vadd.xlane.f32.xlu1 %v371_v21 }
 0x239   : > { %380 = vrot.lane.b32.xlu1 %v326_v7, %s818_s29  ;;  %s703_s29 = sshra.s32 %s446_s15, 4  ;;  %s704_s29 = int_to_ptr.hbm [resolvable:$true] %s703_s29 }
 0x23a   : > { %s705_s17 = scalar_lea.hbm %s704_s29, 8  ;;  %p710_p4 = scmp.lt.s32.totalorder %s704_s29, %s1014_s5 }
 0x23b   : > { %p706_p0 = scmp.ne.s32.totalorder %s704_s29, %s705_s17  ;;  %p711_p5 = scmp.lt.s32.totalorder %s709_s21, %s705_s17 }
 0x23d   : > { %p707_p1 = pnand %p706_p0, %p900_p3  ;;  %p712_p6 = por %p711_p5, %p710_p4 }
 0x23f   : > { %p708_p2 = pneg %p707_p1 }
 0x241   : > { %p713_p7 = pnand %p712_p6, %p708_p2 }
 0x293   : > { %v373_v22 = vpop.xlane.xlu1 %372 }
 0x294   : > { %687 = vrcp.f32 %v373_v22 }
 0x29a   : > { %v688_v23 = vpop.eup %687 }
 0x29b   : > { %v375_v24 = vmul.f32 %v688_v23, %v373_v22 }
 0x29d   : > { %v376_v25 = vsub.f32 2.0, %v375_v24 }
 0x29f   : > { %v377_v26 = vmul.f32 %v688_v23, %v376_v25 }
 0x2a1   : > { %v378_v27 = vmul.f32 %v686_v20, %v377_v26 }
 0x2a3   : > { %379 = vst.msk [vmem:[%s279_s26] sm:$0xff] %vm332_vm1, %v378_v27 }
 0x2ab   : > { %v381_v28 = vpop.permute.xlu1 %380 }
 0x2ac   : > { %401 = vmatpush.msra.mxu2 %v381_v28 }
 0x2ad   : > { %596 = vmatmul.msk.f32.vlgmr.msra.gmra.mxu2 %vm332_vm1, %v378_v27 }
 0x2ae   : > { %716 = shalt.err (!%p713_p7)
}
 0x2af   : > { %607 = dma.vmem_to_hbm [thread:$0]  (%p900_p3), %s444_s14, 128, %s446_s15, %s413_s16  }
 0x2b0   : > { %s425_s10 = scalar_lea.hbm %s1013_s4, %s600_s8  ;;  %s1024_s0 = sshll.u32 %s941_s13, 3 }
 0x2b1   : > { %s272_s12 = scalar_lea.vmem [#allocation2], %s1024_s0  ;;  %s429_s1 = sshll.u32 %s425_s10, 4  ;;  %s430_s1 = int_to_ptr.hbm [resolvable:$true] %s429_s1 }
 0x2b2   : > { %s427_s22 = sshll.u32 %s272_s12, 4  ;;  %s408_s17 = scalar_lea.sflag [#allocation3], %s941_s13  ;;  %s428_s22 = int_to_ptr.vmem [resolvable:$true] %s427_s22 }
 0x2b3   : > { %s731_s29 = sshra.s32 %s430_s1, 4  ;;  %s737_s8 = scalar_lea.hbm %s1013_s4, 64  ;;  %s732_s29 = int_to_ptr.hbm [resolvable:$true] %s731_s29 }
 0x2b4   : > { %s733_s21 = scalar_lea.hbm %s732_s29, 8  ;;  %p738_p12 = scmp.lt.s32.totalorder %s732_s29, %s1013_s4 }
 0x2b5   : > { %p734_p9 = scmp.ne.s32.totalorder %s732_s29, %s733_s21  ;;  %p739_p13 = scmp.lt.s32.totalorder %s737_s8, %s733_s21 }
 0x2b7   : > { %p735_p10 = pnand %p734_p9, %p900_p3  ;;  %p740_p0 = por %p739_p13, %p738_p12 }
 0x2b9   : > { %p736_p11 = pneg %p735_p10 }
 0x2bb   : > { %p741_p1 = pnand %p740_p0, %p736_p11 }
 0x330   : > { %v403_v29 = vpop.f32.mrf.mxu2 }
 0x331   : > { %406 = vst.msk [vmem:[%s272_s12] sm:$0xff] %vm332_vm1, %v403_v29 }
 0x332   : > { %744 = shalt.err (!%p741_p1)
}
 0x333   : > { %606 = dma.vmem_to_hbm [thread:$0]  (%p900_p3), %s428_s22, 128, %s430_s1, %s408_s17  }
 0x334 PF: > { %p617_p2 = scmp.ge.s32.totalorder %s815_s25, 2  ;;  %s457_s13 = sand.u32 1, %s787_s18  }
 0x335   : > { %s458_s30 = scalar_lea.sflag [#allocation3], %s457_s13 }
 0x336   : > { %p611_p4 = pnand %p617_p2, %p909_p8 }
 0x338   : > { %p612_p5 = pneg %p611_p4 }
 0x33a   : > { %778 = dma.done.wait (%p612_p5), %s458_s30, 128  }
 0x33b   : > { %780 = vsyncadd (%p612_p5), %s458_s30, 4294967168  ;;  %s468_s26 = scalar_lea.sflag [#allocation5], %s457_s13 }
 0x33c   : > { %782 = dma.done.wait (%p612_p5), %s468_s26, 128  }
 0x33d   : > { %784 = vsyncadd (%p612_p5), %s468_s26, 4294967168  ;;  %s22_s25 = sadd.s32 1, %s815_s25   ;;  %s1025_s1 = sld [smem:[#allocation8_spill]] }
 0x33e   : > { %p19_p6 = scmp.ge.s32.totalorder %s22_s25, 10   ;;  %s1026_s18 = smov %s791_s19 }
 0x33f   : > { %s1027_s19 = smov %s795_s20  ;;  %s1028_s20 = smov %s918_s11 }
 0x340   : > { %s1029_s21 = smov %s807_s23  ;;  %s1030_s22 = smov %s811_s24 }
 0x341   : > { %s1031_s23 = smov %s1034_s28  ;;  %21 = sbr.rel (!%p19_p6) target bundleno = 10 (0xa), region = 97 }
 0x343   : > { %s1032_s24 = smov %s1025_s1 }
 0x346   :  { %474 = vsyncpa [#allocation3], 1 }
 0x347   :  { %476 = vsyncpa [#allocation3 + $0x1], 1 }
 0x348   :  { %477 = vsyncpa [#allocation5], 1 }
 0x349   :  { %479 = vsyncpa [#allocation5 + $0x1], 1 }

</bundles_post_ra>
